<compile_context>
chip_gen: v6e
topology: v6e:2x2x1
jax: 0.10.0
libtpu: 0.0.40
codegen_flags: <defaults>
</compile_context>

<pallas_src>
import functools

import jax
import jax.numpy as jnp
import numpy as np
from jax import lax
from jax.experimental import pallas as pl
from jax.experimental.pallas import tpu as pltpu


def _apply_vmem_bytes(C, tile_n):
    # pass-2 per-step footprint: 2 bf16 input tiles + 2 f32 output tiles,
    # double-buffered, plus (C,C) weights / W_eff and (C,1) vectors.
    tok = 2 * (2 * C * tile_n * 2 + 2 * C * tile_n * 4)
    wts = 12 * C * C * 2 + 24 * C * 4
    return tok + wts


def _pick_tile_n(N, C, budget=24 * 1024 * 1024):
    for t in (2048, 1024, 512, 256, 128):
        if N % t == 0 and _apply_vmem_bytes(C, t) <= budget:
            return t
    # Small / irregular N: keep the full extent (block == full dim is legal).
    # For production N not divisible by 128, prefer padding N up to a multiple
    # of 128 in the wrapper (with token masking in the Gram pass) to avoid
    # masked sub-128-lane stores.
    return N


# -----------------------------------------------------------------------------
# Pass 1a: partial Gram matrices  G[b, s] = sum_{n in split s} u3 @ u3^T
# grid = (B, n_split, tiles_per_split); last axis is the reduction, the
# accumulator lives in the (resident) f32 output block.
# -----------------------------------------------------------------------------
def _gram_kernel(seg_ref, w3u_ref, b3_ref, g_ref):
    n = pl.program_id(2)

    @pl.when(n == 0)
    def _():
        g_ref[...] = jnp.zeros_like(g_ref)

    u3 = jnp.maximum(
        jnp.dot(w3u_ref[...], seg_ref[...],
                preferred_element_type=jnp.float32) + b3_ref[...], 0.0)
    u3b = u3.astype(jnp.bfloat16)
    # G += u3 @ u3^T  (contract over tokens)
    g_ref[...] += lax.dot_general(u3b, u3b, (((1,), (1,)), ((), ())),
                                  preferred_element_type=jnp.float32)


# -----------------------------------------------------------------------------
# Pass 1b: per-batch finalize (tiny).  Sum the partial Grams, build the
# block-diagonal softmaxed attention matrix ctx^T and fold the end projections
# into it:  W_eff = W_end @ ctx^T   (bf16 outputs).
# -----------------------------------------------------------------------------
def _ctx_finalize_kernel(g_ref, wk_ref, wv_ref, we1_ref, we2_ref,
                         weff1_ref, weff2_ref, *, num_heads, scale, n_split):
    G = g_ref[0]
    for s in range(1, n_split):
        G = G + g_ref[s]
    Gb = G.astype(jnp.bfloat16)

    # acc[j, i] = sum_n v[j, n] k[i, n] = (Wv @ G @ Wk^T)[j, i]
    t = jnp.dot(wv_ref[...], Gb, preferred_element_type=jnp.float32)
    acc = lax.dot_general(t.astype(jnp.bfloat16), wk_ref[...],
                          (((1,), (1,)), ((), ())),
                          preferred_element_type=jnp.float32)

    C = acc.shape[0]
    hd = C // num_heads
    row_h = lax.broadcasted_iota(jnp.int32, (C, C), 0) // hd
    col_h = lax.broadcasted_iota(jnp.int32, (C, C), 1) // hd
    logits = jnp.where(row_h == col_h, acc * scale, jnp.float32(-1e30))
    # softmax over i (axis=1 of the transposed layout) within each head block
    m = jnp.max(logits, axis=1, keepdims=True)
    e = jnp.exp(logits - m)
    ctxt = e / jnp.sum(e, axis=1, keepdims=True)      # ctx^T, ~zero off-block
    ctxt_b = ctxt.astype(jnp.bfloat16)

    weff1_ref[...] = jnp.dot(we1_ref[...], ctxt_b,
                             preferred_element_type=jnp.float32
                             ).astype(weff1_ref.dtype)
    weff2_ref[...] = jnp.dot(we2_ref[...], ctxt_b,
                             preferred_element_type=jnp.float32
                             ).astype(weff2_ref.dtype)


# -----------------------------------------------------------------------------
# Pass 2: apply.  grid = (B, N_tiles), both "parallel".
#   r = x + W_eff @ relu(W_u x + b_u) + b_end ; out = LayerNorm_C(r)
# -----------------------------------------------------------------------------
def _apply_kernel(x1_ref, x2_ref, weff1_ref, weff2_ref,
                  w1u_ref, b1_ref, w2u_ref, b2_ref,
                  be1_ref, be2_ref, g1_ref, bt1_ref, g2_ref, bt2_ref,
                  o1_ref, o2_ref, *, eps):

    def branch(x_ref, wu_ref, b_ref, weff_ref, be_ref, g_ref, bt_ref, o_ref):
        xb = x_ref[...]                                  # (C, tile_n) bf16
        u = jnp.maximum(
            jnp.dot(wu_ref[...], xb, preferred_element_type=jnp.float32)
            + b_ref[...], 0.0)
        r = (xb.astype(jnp.float32)
             + jnp.dot(weff_ref[...], u.astype(jnp.bfloat16),
                       preferred_element_type=jnp.float32)
             + be_ref[...])
        # LayerNorm over channels (axis 0 in this layout), f32.
        mu = jnp.mean(r, axis=0, keepdims=True)
        var = jnp.mean((r - mu) ** 2, axis=0, keepdims=True)
        o_ref[...] = ((r - mu) * lax.rsqrt(var + eps) * g_ref[...]
                      + bt_ref[...]).astype(o_ref.dtype)

    # Serialize the two branches to keep peak live intermediates low.
    branch(x1_ref, w1u_ref, b1_ref, weff1_ref, be1_ref, g1_ref, bt1_ref, o1_ref)
    branch(x2_ref, w2u_ref, b2_ref, weff2_ref, be2_ref, g2_ref, bt2_ref, o2_ref)


# -----------------------------------------------------------------------------
# Wrapper: free NCHW -> (B, C, N) reshapes, weight plumbing, three pallas_calls.
# -----------------------------------------------------------------------------
def feature_fusion_moam(x1, x2, segfeature, params, num_heads=8, eps=1e-5):
    B, C, H, W = x1.shape
    N = H * W
    assert C % num_heads == 0
    hd = C // num_heads
    scale = float(hd) ** -0.5

    # NCHW -> (B, C, N) is a pure reshape; tokens are streamed in bf16.
    a1 = x1.reshape(B, C, N).astype(jnp.bfloat16)
    a2 = x2.reshape(B, C, N).astype(jnp.bfloat16)
    a3 = segfeature.reshape(B, C, N).astype(jnp.bfloat16)

    bf = lambda w: w.astype(jnp.bfloat16)
    col = lambda v: v.reshape(C, 1).astype(jnp.float32)

    # PyTorch Linear weight is (out, in); channel-major math uses W @ X.
    # Only the "u" half of each channel_proj feeds the attention path.
    w1u = bf(params["w_proj1"][C:, :]); b1 = col(params["b_proj1"][C:])
    w2u = bf(params["w_proj2"][C:, :]); b2 = col(params["b_proj2"][C:])
    w3u = bf(params["w_proj3"][C:, :]); b3 = col(params["b_proj3"][C:])
    wk = bf(params["w_kv"][:C, :]);     wv = bf(params["w_kv"][C:, :])
    we1 = bf(params["w_end1"]);         be1 = col(params["b_end1"])
    we2 = bf(params["w_end2"]);         be2 = col(params["b_end2"])
    g1 = col(params["ln1_g"]);          bt1 = col(params["ln1_b"])
    g2 = col(params["ln2_g"]);          bt2 = col(params["ln2_b"])

    tile_n = _pick_tile_n(N, C)
    n_tiles = N // tile_n
    n_split = 2 if (n_tiles >= 2 and n_tiles % 2 == 0) else 1
    ntps = n_tiles // n_split          # reduction length per parallel split

    vmem_cap = int(min(48 * 1024 * 1024,
                       max(8 * 1024 * 1024, 3 * _apply_vmem_bytes(C, tile_n))))

    # --- pass 1a: partial Gram matrices ------------------------------------
    w_spec1 = lambda shape: pl.BlockSpec(shape, lambda b, s, n: (0, 0))
    gram = pl.pallas_call(
        _gram_kernel,
        out_shape=jax.ShapeDtypeStruct((B, n_split, C, C), jnp.float32),
        grid=(B, n_split, ntps),
        in_specs=[pl.BlockSpec((None, C, tile_n),
                               lambda b, s, n: (b, 0, s * ntps + n)),
                  w_spec1((C, C)), w_spec1((C, 1))],
        out_specs=pl.BlockSpec((None, None, C, C),
                               lambda b, s, n: (b, s, 0, 0)),
        compiler_params=pltpu.CompilerParams(
            dimension_semantics=("parallel", "parallel", "arbitrary"),
            vmem_limit_bytes=vmem_cap),
        cost_estimate=pl.CostEstimate(
            flops=int(4 * B * N * C * C),
            transcendentals=0,
            bytes_accessed=int(2 * B * N * C + 4 * B * n_split * C * C
                               + 2 * C * C + 4 * C)),
    )(a3, w3u, b3)

    # --- pass 1b: ctx^T + folded end projections (tiny, per batch) ----------
    w_specf = lambda shape: pl.BlockSpec(shape, lambda b: (0, 0))
    weff1, weff2 = pl.pallas_call(
        functools.partial(_ctx_finalize_kernel, num_heads=num_heads,
                          scale=scale, n_split=n_split),
        out_shape=(jax.ShapeDtypeStruct((B, C, C), jnp.bfloat16),
                   jax.ShapeDtypeStruct((B, C, C), jnp.bfloat16)),
        grid=(B,),
        in_specs=[pl.BlockSpec((None, n_split, C, C), lambda b: (b, 0, 0, 0)),
                  w_specf((C, C)), w_specf((C, C)),
                  w_specf((C, C)), w_specf((C, C))],
        out_specs=(pl.BlockSpec((None, C, C), lambda b: (b, 0, 0)),
                   pl.BlockSpec((None, C, C), lambda b: (b, 0, 0))),
        compiler_params=pltpu.CompilerParams(
            dimension_semantics=("parallel",),
            vmem_limit_bytes=vmem_cap),
    )(gram, wk, wv, we1, we2)

    # --- pass 2: u-proj, W_eff @ u, residual, LayerNorm ----------------------
    tok_spec = pl.BlockSpec((None, C, tile_n), lambda b, n: (b, 0, n))
    mat_spec = pl.BlockSpec((None, C, C), lambda b, n: (b, 0, 0))
    w_spec2 = lambda shape: pl.BlockSpec(shape, lambda b, n: (0, 0))
    out1, out2 = pl.pallas_call(
        functools.partial(_apply_kernel, eps=eps),
        out_shape=(jax.ShapeDtypeStruct((B, C, N), jnp.float32),
                   jax.ShapeDtypeStruct((B, C, N), jnp.float32)),
        grid=(B, n_tiles),
        in_specs=[tok_spec, tok_spec, mat_spec, mat_spec,
                  w_spec2((C, C)), w_spec2((C, 1)),
                  w_spec2((C, C)), w_spec2((C, 1)),
                  w_spec2((C, 1)), w_spec2((C, 1)),
                  w_spec2((C, 1)), w_spec2((C, 1)),
                  w_spec2((C, 1)), w_spec2((C, 1))],
        out_specs=(tok_spec, tok_spec),
        compiler_params=pltpu.CompilerParams(
            dimension_semantics=("parallel", "parallel"),
            vmem_limit_bytes=vmem_cap),
        cost_estimate=pl.CostEstimate(
            flops=int(8 * B * N * C * C),
            transcendentals=int(2 * B * N),
            bytes_accessed=int(12 * B * N * C + 4 * B * C * C
                               + 4 * C * C + 24 * C)),
    )(a1, a2, weff1, weff2, w1u, b1, w2u, b2, be1, be2, g1, bt1, g2, bt2)

    # (B, C, N) -> NCHW is again a pure reshape.
    return out1.reshape(B, C, H, W), out2.reshape(B, C, H, W)


# -----------------------------------------------------------------------------
# Deterministic parameter init (Linear: normal*0.02, bias 0; LayerNorm: 1 / 0).
# -----------------------------------------------------------------------------
def init_params(key, dim):
    ks = jax.random.split(key, 6)
    std = 0.02
    lw = lambda k, o, i: std * jax.random.normal(k, (o, i), jnp.float32)
    return {
        "w_proj1": lw(ks[0], 2 * dim, dim), "b_proj1": jnp.zeros((2 * dim,), jnp.float32),
        "w_proj2": lw(ks[1], 2 * dim, dim), "b_proj2": jnp.zeros((2 * dim,), jnp.float32),
        "w_proj3": lw(ks[2], 2 * dim, dim), "b_proj3": jnp.zeros((2 * dim,), jnp.float32),
        "w_kv":    lw(ks[3], 2 * dim, dim),
        "w_end1":  lw(ks[4], dim, dim),     "b_end1": jnp.zeros((dim,), jnp.float32),
        "w_end2":  lw(ks[5], dim, dim),     "b_end2": jnp.zeros((dim,), jnp.float32),
        "ln1_g": jnp.ones((dim,), jnp.float32), "ln1_b": jnp.zeros((dim,), jnp.float32),
        "ln2_g": jnp.ones((dim,), jnp.float32), "ln2_b": jnp.zeros((dim,), jnp.float32),
    }


# -----------------------------------------------------------------------------
# Pure-JAX f32 reference (mirrors the PyTorch forward) for a correctness check.
# -----------------------------------------------------------------------------
def reference(x1, x2, segfeature, p, num_heads=8, eps=1e-5):
    B, C, H, W = x1.shape
    N = H * W
    hd = C // num_heads
    scale = float(hd) ** -0.5
    tok = lambda x: jnp.transpose(x.reshape(B, C, N), (0, 2, 1))
    a1, a2, a3 = tok(x1), tok(x2), tok(segfeature)
    lin = lambda x, w, b=None: x @ w.T + (0.0 if b is None else b)

    u1 = jax.nn.relu(lin(a1, p["w_proj1"], p["b_proj1"]))[..., C:]
    u2 = jax.nn.relu(lin(a2, p["w_proj2"], p["b_proj2"]))[..., C:]
    u3 = jax.nn.relu(lin(a3, p["w_proj3"], p["b_proj3"]))[..., C:]

    kv = lin(u3, p["w_kv"]).reshape(B, N, 2, num_heads, hd).transpose(2, 0, 3, 1, 4)
    k, v = kv[0], kv[1]                                   # (B, Hh, N, hd)
    ctx = jnp.einsum("bhnd,bhne->bhde", k, v) * scale
    ctx = jax.nn.softmax(ctx, axis=-2)
    q1 = u1.reshape(B, N, num_heads, hd).transpose(0, 2, 1, 3)
    q2 = u2.reshape(B, N, num_heads, hd).transpose(0, 2, 1, 3)
    v1 = jnp.einsum("bhnd,bhde->bhne", q1, ctx).transpose(0, 2, 1, 3).reshape(B, N, C)
    v2 = jnp.einsum("bhnd,bhde->bhne", q2, ctx).transpose(0, 2, 1, 3).reshape(B, N, C)

    def ln(r, g, b):
        mu = jnp.mean(r, axis=-1, keepdims=True)
        var = jnp.mean((r - mu) ** 2, axis=-1, keepdims=True)
        return (r - mu) / jnp.sqrt(var + eps) * g + b

    o1 = ln(a1 + lin(v1, p["w_end1"], p["b_end1"]), p["ln1_g"], p["ln1_b"])
    o2 = ln(a2 + lin(v2, p["w_end2"], p["b_end2"]), p["ln2_g"], p["ln2_b"])
    back = lambda o: jnp.transpose(o.reshape(B, H, W, C), (0, 3, 1, 2))
    return back(o1), back(o2)


if __name__ == "__main__":
    B, C, H, W = 2, 32, 16, 16        # dim=32, num_heads=8 -> head_dim=4, N=256
    num_heads = 8

    key = jax.random.PRNGKey(0)
    k1, k2, k3, kp = jax.random.split(key, 4)
    x1 = jax.random.normal(k1, (B, C, H, W), jnp.float32)
    x2 = jax.random.normal(k2, (B, C, H, W), jnp.float32)
    seg = jax.random.normal(k3, (B, C, H, W), jnp.float32)
    params = init_params(kp, C)

    o1, o2 = feature_fusion_moam(x1, x2, seg, params, num_heads=num_heads)
    jax.block_until_ready((o1, o2))

    r1, r2 = reference(x1, x2, seg, params, num_heads=num_heads)
    # bf16 token streaming + bf16 matmul operands vs f32 reference -> loose tol.
    np.testing.assert_allclose(np.asarray(o1), np.asarray(r1), rtol=2e-2, atol=2e-2)
    np.testing.assert_allclose(np.asarray(o2), np.asarray(r2), rtol=2e-2, atol=2e-2)

    print("KERNEL_OK")
</pallas_src>

<mosaic_0001>
module attributes {stable_mosaic.version = 11 : i64} {
  func.func @_gram_kernel(%arg0: i32, %arg1: i32, %arg2: i32, %arg3: memref<1x32x256xbf16, #tpu.memory_space<vmem>>, %arg4: memref<32x32xbf16, #tpu.memory_space<vmem>>, %arg5: memref<32x1xf32, #tpu.memory_space<vmem>>, %arg6: memref<1x1x32x32xf32, #tpu.memory_space<vmem>>) attributes {dimension_semantics = [#tpu.dimension_semantics<parallel>, #tpu.dimension_semantics<parallel>, #tpu.dimension_semantics<arbitrary>], iteration_bounds = array<i64: 2, 1, 1>, scalar_prefetch = 0 : i64, scratch_operands = 0 : i64, tpu.core_type = #tpu.core_type<tc>, window_params = [{transform_indices = @transform_0, window_bounds = array<i64: 1, 32, 256>}, {pipeline_mode = #tpu.pipeline_mode<synchronous>, transform_indices = @transform_1, window_bounds = array<i64: 32, 32>}, {pipeline_mode = #tpu.pipeline_mode<synchronous>, transform_indices = @transform_2, window_bounds = array<i64: 32, 1>}, {transform_indices = @transform_3, window_bounds = array<i64: 1, 1, 32, 32>}]} {
    %c0_i32 = arith.constant 0 : i32
    %0 = arith.cmpi eq, %arg2, %c0_i32 : i32
    %1 = arith.extui %0 : i1 to i32
    %c0_i32_0 = arith.constant 0 : i32
    %2 = arith.cmpi ne, %1, %c0_i32_0 : i32
    scf.if %2 {
      %cst_17 = arith.constant 0.000000e+00 : f32
      %20 = vector.broadcast %cst_17 : f32 to vector<32x32xf32>
      %c0_18 = arith.constant 0 : index
      %c0_19 = arith.constant 0 : index
      %c0_20 = arith.constant 0 : index
      %c0_21 = arith.constant 0 : index
      %21 = vector.load %arg6[%c0_18, %c0_19, %c0_20, %c0_21] : memref<1x1x32x32xf32, #tpu.memory_space<vmem>>, vector<1x1x32x32xf32>
      %22 = vector.shape_cast %21 : vector<1x1x32x32xf32> to vector<32x32xf32>
      %23 = vector.shape_cast %20 : vector<32x32xf32> to vector<1x1x32x32xf32>
      tpu.vector_store %arg6[%c0_18, %c0_19, %c0_20, %c0_21], %23 {strides = array<i32>} : memref<1x1x32x32xf32, #tpu.memory_space<vmem>>, vector<1x1x32x32xf32>,
    } else {
    }
    %c0 = arith.constant 0 : index
    %c0_1 = arith.constant 0 : index
    %3 = vector.load %arg4[%c0, %c0_1] : memref<32x32xbf16, #tpu.memory_space<vmem>>, vector<32x32xbf16>
    %c0_2 = arith.constant 0 : index
    %c0_3 = arith.constant 0 : index
    %c0_4 = arith.constant 0 : index
    %4 = vector.load %arg3[%c0_2, %c0_3, %c0_4] : memref<1x32x256xbf16, #tpu.memory_space<vmem>>, vector<1x32x256xbf16>
    %5 = vector.shape_cast %4 : vector<1x32x256xbf16> to vector<32x256xbf16>
    %cst = arith.constant dense<0.000000e+00> : vector<32x256xf32>
    %6 = tpu.matmul %3, %5, %cst {dimension_numbers = #tpu.dot_dimension_numbers<[1], [0], [0], [1], [0, 0, 1, 1], [], []>} : vector<32x32xbf16>, vector<32x256xbf16>, vector<32x256xf32> -> vector<32x256xf32>
    %c0_5 = arith.constant 0 : index
    %c0_6 = arith.constant 0 : index
    %7 = vector.load %arg5[%c0_5, %c0_6] : memref<32x1xf32, #tpu.memory_space<vmem>>, vector<32x1xf32>
    %8 = vector.broadcast %7 : vector<32x1xf32> to vector<32x256xf32>
    %9 = arith.addf %6, %8 : vector<32x256xf32>
    %cst_7 = arith.constant 0.000000e+00 : f32
    %10 = vector.broadcast %cst_7 : f32 to vector<32x256xf32>
    %11 = arith.maximumf %9, %10 : vector<32x256xf32>
    %12 = arith.truncf %11 : vector<32x256xf32> to vector<32x256xbf16>
    %c0_8 = arith.constant 0 : index
    %c0_9 = arith.constant 0 : index
    %c0_10 = arith.constant 0 : index
    %c0_11 = arith.constant 0 : index
    %13 = vector.load %arg6[%c0_8, %c0_9, %c0_10, %c0_11] : memref<1x1x32x32xf32, #tpu.memory_space<vmem>>, vector<1x1x32x32xf32>
    %14 = vector.shape_cast %13 : vector<1x1x32x32xf32> to vector<32x32xf32>
    %cst_12 = arith.constant dense<0.000000e+00> : vector<32x32xf32>
    %15 = tpu.matmul %12, %12, %cst_12 {dimension_numbers = #tpu.dot_dimension_numbers<[1], [1], [0], [0], [0, 0, 1, 0], [], []>} : vector<32x256xbf16>, vector<32x256xbf16>, vector<32x32xf32> -> vector<32x32xf32>
    %16 = arith.addf %14, %15 : vector<32x32xf32>
    %c0_13 = arith.constant 0 : index
    %c0_14 = arith.constant 0 : index
    %c0_15 = arith.constant 0 : index
    %c0_16 = arith.constant 0 : index
    %17 = vector.load %arg6[%c0_13, %c0_14, %c0_15, %c0_16] : memref<1x1x32x32xf32, #tpu.memory_space<vmem>>, vector<1x1x32x32xf32>
    %18 = vector.shape_cast %17 : vector<1x1x32x32xf32> to vector<32x32xf32>
    %19 = vector.shape_cast %16 : vector<32x32xf32> to vector<1x1x32x32xf32>
    tpu.vector_store %arg6[%c0_13, %c0_14, %c0_15, %c0_16], %19 {strides = array<i32>} : memref<1x1x32x32xf32, #tpu.memory_space<vmem>>, vector<1x1x32x32xf32>,
    return
  }
  func.func @transform_0(%arg0: i32, %arg1: i32, %arg2: i32) -> (i32, i32, i32) {
    %c1_i32 = arith.constant 1 : i32
    %0 = arith.muli %arg1, %c1_i32 : i32
    %1 = arith.addi %0, %arg2 : i32
    %c0_i32 = arith.constant 0 : i32
    %c0_i32_0 = arith.constant 0 : i32
    return %arg0, %c0_i32, %1 : i32, i32, i32
  }
  func.func @transform_1(%arg0: i32, %arg1: i32, %arg2: i32) -> (i32, i32) {
    %c0_i32 = arith.constant 0 : i32
    %c0_i32_0 = arith.constant 0 : i32
    %c0_i32_1 = arith.constant 0 : i32
    return %c0_i32, %c0_i32_0 : i32, i32
  }
  func.func @transform_2(%arg0: i32, %arg1: i32, %arg2: i32) -> (i32, i32) {
    %c0_i32 = arith.constant 0 : i32
    %c0_i32_0 = arith.constant 0 : i32
    %c0_i32_1 = arith.constant 0 : i32
    return %c0_i32, %c0_i32_0 : i32, i32
  }
  func.func @transform_3(%arg0: i32, %arg1: i32, %arg2: i32) -> (i32, i32, i32, i32) {
    %c0_i32 = arith.constant 0 : i32
    %c0_i32_0 = arith.constant 0 : i32
    %c0_i32_1 = arith.constant 0 : i32
    return %arg0, %arg1, %c0_i32, %c0_i32_0 : i32, i32, i32, i32
  }
}

</mosaic_0001>

<bundles_post_ra>
// kernel: tpu_custom_call.1
= control target key start
LH: loop header
LB: loop body
LE: loop exit
PB: predicated region body
PF: predicated region fallthrough
CT: control target
= control target key end

     0   :  { %8 = vsyncpa [#allocation3], 0  ;;  %s965_s0 = inlined_call_operand.hbm [shape: bf16[2,32,256], index: 0, kind: input, shape index: {}]   ;;  %s966_s1 = inlined_call_operand.vmem [shape: bf16[32,32], index: 1, kind: input, shape index: {}]   ;;  %s967_s2 = inlined_call_operand.vmem [shape: f32[32,1], index: 2, kind: input, shape index: {}]   ;;  %s968_s3 = inlined_call_operand.hbm [shape: f32[2,1,32,32], index: 3, kind: output, shape index: {}]  }
   0x1   :  { %10 = vsyncpa [#allocation3 + $0x1], 0 }
   0x2   :  { %11 = vsyncpa [#allocation4], 0 }
   0x3   :  { %13 = vsyncpa [#allocation4 + $0x1], 0  ;;  %s772_s12 = smov 0   ;;  %s774_s13 = smov 0  }
   0x4   :  { %s776_s14 = smov 0   ;;  %s778_s15 = smov 0  }
   0x5   :  { %s780_s16 = smov 0   ;;  %s782_s17 = smov 0  }
   0x6 LB: > { %s531_s18 = sadd.s32 4294967295, %s742_s17   ;;  %s532_s19 = sadd.s32 4294967294, %s742_s17   ;;  %s742_s17 = sphi %s782_s17, %s19_s17   ;;  %s738_s16 = sphi %s780_s16, %s979_s16   ;;  %s734_s15 = sphi %s778_s15, %s978_s15   ;;  %s730_s14 = sphi %s776_s14, %s977_s14   ;;  %s726_s13 = sphi %s774_s13, %s976_s13   ;;  %s722_s12 = sphi %s772_s12, %s975_s12  }
   0x7   : > { %s38_s20 = sadd.s32 1, %s738_s16  ;;  %s49_s21 = sadd.s32 1, %s730_s14 }
   0x8   : > { %p40_p0 = scmp.ge.s32.totalorder %s38_s20, 2  ;;  %p56_p1 = scmp.ne.s32.totalorder %s730_s14, %s726_s13 }
   0x9   : > { %p57_p2 = scmp.eq.s32.totalorder %s742_s17, 0  ;;  %p62_p3 = scmp.ne.s32.totalorder %s726_s13, %s722_s12 }
   0xa   : > { %s981_s20 = smov (%p40_p0, %s38_s20), 0  ;;  %p63_p5 = scmp.eq.s32.totalorder %s531_s18, 0 }
   0xb   : > { %p813_p4 = por %p57_p2, %p56_p1  ;;  %s44_s23 = ssub.s32 %s738_s16, %s981_s20 }
   0xc   : > { %p130_p6 = scmp.eq.s32.totalorder %s531_s18, 1  ;;  %p47_p7 = scmp.eq.s32.totalorder %s44_s23, 0 }
   0xd   : > { %p819_p8 = por %p63_p5, %p62_p3  ;;  %p136_p10 = scmp.eq.s32.totalorder %s532_s19, 1 }
   0xe   : > { %p823_p9 = por %p130_p6, %p56_p1  ;;  %p568_p13 = scmp.lt.s32.totalorder %s742_s17, 2 }
   0xf   : > { %s828_s26 = scalar_select %p47_p7, %s730_s14, %s49_s21  }
  0x10   : > { %p830_p11 = por %p136_p10, %p62_p3  ;;  %s162_s28 = sand.u32 1, %s730_s14  }
  0x11   : > { %s535_s29 = sshll.u32 %s162_s28, 5  ;;  %s554_s30 = sshll.u32 %s738_s16, 9 }
  0x12   : > { %s175_s6 = scalar_lea.hbm %s965_s0, %s554_s30  ;;  %s166_s7 = scalar_lea.vmem [#allocation2], %s535_s29 }
  0x13   : > { %s176_s8 = sshll.u32 %s166_s7, 4  ;;  %p843_p0 = pnand %p568_p13, %p813_p4  ;;  %s177_s8 = int_to_ptr.vmem [resolvable:$true] %s176_s8 }
  0x14   : > { %p538_p1 = scmp.ge.s32.totalorder %s742_s17, 1  ;;  %s163_s10 = scalar_lea.sflag [#allocation3], %s162_s28 }
  0x15   : > { %p636_p2 = pneg %p843_p0  ;;  %s647_s11 = scalar_lea.vmem %s177_s8, 512 }
  0x16   : > { %p648_p3 = scmp.ne.s32.totalorder %s177_s8, %s647_s11  ;;  %s744_s18 = smov [#allocation2]  }
  0x17   : > { %s652_s19 = sshll.u32 %s744_s18, 4  ;;  %s653_s19 = int_to_ptr.vmem [resolvable:$false] %s652_s19 }
  0x18   : > { %p650_p5 = pnand %p648_p3, %p636_p2  ;;  %s654_s21 = scalar_lea.vmem %s653_s19, 1024 }
  0x19   : > { %p655_p7 = scmp.lt.s32.totalorder %s177_s8, %s653_s19  ;;  %p656_p10 = scmp.lt.s32.totalorder %s654_s21, %s647_s11 }
  0x1a   : > { %p651_p6 = pneg %p650_p5 }
  0x1b   : > { %p657_p12 = por %p656_p10, %p655_p7 }
  0x1d   : > { %p658_p4 = pnand %p657_p12, %p651_p6 }
  0x1f   : > { %661 = shalt.err (!%p658_p4)
}
  0x20   : > { %s745_s22 = smov 128   ;;  %s746_s23 = smov 8  }
  0x21   : > { %563 = dma.hbm_to_vmem [thread:$0]  (!%p843_p0), %s175_s6, 512, %s177_s8, %s163_s10, %s745_s22, %s745_s22, %s746_s23  }
  0x22   : > { %p184_p13 = scmp.lt.s32.totalorder %s742_s17, 3 }
  0x24   : > { %p185_p2 = pnand %p538_p1, %p184_p13 }
  0x25   : > { %s856_s28 = sand.u32 (!%p185_p2), 1, %s726_s13  }
  0x26   : > { %188 = sbr.rel (%p185_p2) target bundleno = 504 (0x1f8), region = 32  ;;  %s539_s29 = sshll.u32 (!%p185_p2), %s856_s28, 5 }
  0x27   : > { %s191_s30 = scalar_lea.sflag (!%p185_p2), [#allocation3], %s856_s28  ;;  %s194_s4 = scalar_lea.vmem (!%p185_p2), [#allocation2], %s539_s29 }
  0x2b   : > { %713 = dma.done.wait (%p819_p8), %s191_s30, 512  }
  0x2c   : > { %715 = vsyncadd (%p819_p8), %s191_s30, 4294966784  ;;  %v747_v0 = vmov 0   ;;  %v626_v1 = vld [vmem:[%s194_s4 + $0x14] ss:$8 sps:$4 sm:$0xff]   ;;  %v628_v2 = vld [vmem:[%s194_s4 + $0x10] ss:$8 sps:$4 sm:$0xff]  }
  0x2d   : > { %330 = vmatprep.mubr.bf16.mxu0 %v747_v0  ;;  %625 = vset.pattern.permute.xlu1 %v747_v0  ;;  %v629_v3 = vld [vmem:[%s194_s4 + $0x4] ss:$8 sps:$4 sm:$0xff]   ;;  %v631_v4 = vld [vmem:[%s194_s4] ss:$8 sps:$4 sm:$0xff]   ;;  %v239_v6 = vld [vmem:[%s967_s2 + $0x10] sm:$0xff]  ;;  %vm224_vm0 = vcmask 261120  }
  0x2e   : > { %624 = vset.pattern.permute.xlu0 %v747_v0  ;;  %310 = vmatprep.subr.bf16.mxu0 %v626_v1  ;;  %v237_v5 = vld [vmem:[%s967_s2] sm:$0xff]  ;;  %v238_v8 = vld [vmem:[%s967_s2 + $0x8] sm:$0xff]  ;;  %v240_v9 = vld [vmem:[%s967_s2 + $0x18] sm:$0xff]  ;;  %s888_s23 = scalar_lea.vmem [#allocation5], %s539_s29  ;;  %v748_v11 = vmov 0.0   ;;  %s555_s29 = sshll.u32 %s734_s15, 9 }
  0x2f   : > { %311 = vmatpush1.bf16.msra.mxu0 %v628_v2  ;;  %243 = vperm.xlu1 %625, %v237_v5   ;;  %v632_v7 = vld [vmem:[%s966_s1] sm:$0xff]   ;;  %v633_v10 = vld [vmem:[%s966_s1 + $0x8] sm:$0xff]   ;;  %225 = vst.msk [vmem:[%s888_s23] sm:$0xff] %vm224_vm0, %v748_v11  ;;  %226 = vst.msk [vmem:[%s888_s23 + $0x8] sm:$0xff] %vm224_vm0, %v748_v11  ;;  %s440_s30 = sshll.u32 %s888_s23, 4  ;;  %s913_s6 = scalar_lea.hbm %s968_s3, %s555_s29  ;;  %s915_s30 = int_to_ptr.vmem [resolvable:$true] %s440_s30 }
  0x30   : > { %312 = vmatprep.subr.bf16.mxu0 %v629_v3  ;;  %253 = vperm.xlu0 %624, %v239_v6   ;;  %227 = vst.msk [vmem:[%s888_s23 + $0x10] sm:$0xff] %vm224_vm0, %v748_v11  ;;  %228 = vst.msk [vmem:[%s888_s23 + $0x18] sm:$0xff] %vm224_vm0, %v748_v11  ;;  %s425_s15 = scalar_lea.sflag [#allocation4], %s856_s28  ;;  %s662_s7 = scalar_lea.vmem %s915_s30, 512 }
  0x31   : > { %p663_p8 = scmp.ne.s32.totalorder %s915_s30, %s662_s7  ;;  %s749_s24 = smov [#allocation5]  }
  0x32   : > { %s666_s8 = sshll.u32 %s749_s24, 4  ;;  %s667_s8 = int_to_ptr.vmem [resolvable:$false] %s666_s8 }
  0x33   : > { %313 = vmatpush1.bf16.msra.mxu0 %v631_v4  ;;  %248 = vperm.xlu1 %625, %v238_v8   ;;  %p664_p12 = pnand %p663_p8, %p823_p9  ;;  %s668_s9 = scalar_lea.vmem %s667_s8, 1024 }
  0x34   : > { %258 = vperm.xlu0 %624, %v240_v9   ;;  %p669_p1 = scmp.lt.s32.totalorder %s915_s30, %s667_s8  ;;  %p670_p3 = scmp.lt.s32.totalorder %s668_s9, %s662_s7 }
  0x35   : > { %p665_p0 = pneg %p664_p12 }
  0x36   : > { %547 = vmatmul.mubr.msk.bf16.vlgmr.msra.gmra.mxu0 %vm224_vm0, %v632_v7  ;;  %v363_v44 = vld [vmem:[%s888_s23] sm:$0xff]  ;;  %v364_v48 = vld [vmem:[%s888_s23 + $0x8] sm:$0xff]  ;;  %p671_p5 = por %p670_p3, %p669_p1 }
  0x37   : > { %340 = vmatprep.mubr.bf16.mxu0 %v747_v0  ;;  %v365_v52 = vld [vmem:[%s888_s23 + $0x10] sm:$0xff]  ;;  %v366_v56 = vld [vmem:[%s888_s23 + $0x18] sm:$0xff] }
  0x38   : > { %p672_p6 = pnand %p671_p5, %p665_p0 }
  0x3e   : > { %548 = vmatmul.mubr.msk.bf16.gmra.mxu0 %vm224_vm0, %v633_v10 }
  0xaa   : > { %v244_v12 = vpop.permute.xlu1 %243 }
  0xab   : > { %v254_v17 = vpop.permute.xlu0 %253 }
  0xae   : > { %v249_v18 = vpop.permute.xlu1 %248 }
  0xaf   : > { %v259_v26 = vpop.permute.xlu0 %258 }
  0xf6   : > { %v332_v13 = vpop.f32.mrf.mxu0 }
  0xf7   : > { %v333_v40 = vadd.f32 %v332_v13, %v244_v12 }
  0xf8   : > { %v334_v14 = vpop.f32.mrf.mxu0 }
  0xf9   : > { %v335_v16 = vadd.f32 %v334_v14, %v244_v12  ;;  %v351_v42 = vmax.f32 %v333_v40, 0.0 }
  0xfa   : > { %v336_v15 = vpop.f32.mrf.mxu0 }
  0xfb   : > { %v352_v22 = vmax.f32 %v335_v16, 0.0  ;;  %v337_v38 = vadd.f32 %v336_v15, %v249_v18 }
  0xfc   : > { %v338_v19 = vpop.f32.mrf.mxu0 }
  0xfd   : > { %v339_v20 = vadd.f32 %v338_v19, %v249_v18  ;;  %v353_v41 = vmax.f32 %v337_v38, 0.0 }
  0xfe   : > { %v342_v21 = vpop.f32.mrf.mxu0 }
  0xff   : > { %v354_v23 = vmax.f32 %v339_v20, 0.0  ;;  %v343_v30 = vadd.f32 %v342_v21, %v254_v17  ;;  %v359_v43 = vpack.c.bf16 %v353_v41, %v351_v42 }
 0x100   : > { %v344_v24 = vpop.f32.mrf.mxu0 }
 0x101   : > { %v360_v25 = vpack.c.bf16 %v354_v23, %v352_v22  ;;  %v345_v28 = vadd.f32 %v344_v24, %v254_v17  ;;  %v355_v36 = vmax.f32 %v343_v30, 0.0 }
 0x102   : > { %v346_v27 = vpop.f32.mrf.mxu0 }
 0x103   : > { %v347_v29 = vadd.f32 %v346_v27, %v259_v26  ;;  %399 = vmatprep.mubr.bf16.mxu1 %v360_v25  ;;  %v356_v34 = vmax.f32 %v345_v28, 0.0 }
 0x104   : > { %v348_v31 = vpop.f32.mrf.mxu0 }
 0x105   : > { %v349_v32 = vadd.f32 %v348_v31, %v259_v26  ;;  %v357_v33 = vmax.f32 %v347_v29, 0.0 }
 0x107   : > { %v358_v35 = vmax.f32 %v349_v32, 0.0  ;;  %v361_v39 = vpack.c.bf16 %v357_v33, %v355_v36 }
 0x109   : > { %v362_v37 = vpack.c.bf16 %v358_v35, %v356_v34 }
 0x10b   : > { %379 = vmatprep.subr.bf16.mxu1 %v362_v37 }
 0x10c   : > { %380 = vmatpush1.bf16.xpose.msra.mxu1 %v361_v39 }
 0x10d   : > { %381 = vmatprep.subr.bf16.mxu1 %v360_v25 }
 0x114   : > { %382 = vmatpush1.bf16.xpose.msra.mxu1 %v359_v43 }
 0x11b   : > { %400 = vmatmul.mubr.bf16.vlgmr.msra.gmra.mxu1 %v359_v43 }
 0x11c   : > { %407 = vmatprep.mubr.bf16.mxu1 %v362_v37 }
 0x123   : > { %408 = vmatmul.mubr.bf16.gmra.mxu1 %v361_v39 }
 0x1db   : > { %v401_v45 = vpop.f32.mrf.mxu1 }
 0x1dc   : > { %v416_v46 = vadd.f32 %v401_v45, %v363_v44 }
 0x1dd   : > { %v403_v47 = vpop.f32.mrf.mxu1 }
 0x1de   : > { %420 = vst.msk [vmem:[%s888_s23] sm:$0xff] %vm224_vm0, %v416_v46 }
 0x1df   : > { %v404_v49 = vpop.f32.mrf.mxu1 }
 0x1e0   : > { %v417_v50 = vadd.f32 %v404_v49, %v364_v48 }
 0x1e1   : > { %v406_v51 = vpop.f32.mrf.mxu1 }
 0x1e2   : > { %421 = vst.msk [vmem:[%s888_s23 + $0x8] sm:$0xff] %vm224_vm0, %v417_v50 }
 0x1e3   : > { %v409_v53 = vpop.f32.mrf.mxu1 }
 0x1e4   : > { %v418_v54 = vadd.f32 %v409_v53, %v365_v52 }
 0x1e5   : > { %v411_v55 = vpop.f32.mrf.mxu1 }
 0x1e6   : > { %422 = vst.msk [vmem:[%s888_s23 + $0x10] sm:$0xff] %vm224_vm0, %v418_v54 }
 0x1e7   : > { %v412_v57 = vpop.f32.mrf.mxu1 }
 0x1e8   : > { %v419_v58 = vadd.f32 %v412_v57, %v366_v56 }
 0x1e9   : > { %v414_v59 = vpop.f32.mrf.mxu1 }
 0x1ea   : > { %423 = vst.msk [vmem:[%s888_s23 + $0x18] sm:$0xff] %vm224_vm0, %v419_v58 }
 0x1eb   : > { %675 = shalt.err (!%p672_p6)
}
 0x1ec   : > { %s676_s10 = scalar_lea.hbm %s913_s6, 512  ;;  %s680_s19 = scalar_lea.hbm %s968_s3, 1024 }
 0x1ed   : > { %p677_p7 = scmp.ne.s32.totalorder %s913_s6, %s676_s10  ;;  %p681_p13 = scmp.lt.s32.totalorder %s913_s6, %s968_s3 }
 0x1ee   : > { %p682_p2 = scmp.lt.s32.totalorder %s680_s19, %s676_s10 }
 0x1ef   : > { %p678_p10 = pnand %p677_p7, %p823_p9 }
 0x1f0   : > { %p683_p8 = por %p682_p2, %p681_p13 }
 0x1f1   : > { %p679_p4 = pneg %p678_p10 }
 0x1f3   : > { %p684_p12 = pnand %p683_p8, %p679_p4 }
 0x1f5   : > { %687 = shalt.err (!%p684_p12)
}
 0x1f6   : > { %s750_s23 = smov 128   ;;  %s751_s29 = smov 8  }
 0x1f7   : > { %558 = dma.vmem_to_hbm [thread:$0]  (%p823_p9), %s915_s30, 512, %s913_s6, %s425_s15, %s750_s23, %s750_s23, %s751_s29  }
 0x1f8 PF: > { %s455_s4 = sand.u32 1, %s722_s12   ;;  %p974_p0 = scmp.ge.s32.totalorder %s742_s17, 2 }
 0x1f9   : > { %s456_s5 = scalar_lea.sflag [#allocation4], %s455_s4 }
 0x1fa   : > { %p565_p1 = pnand %p974_p0, %p830_p11 }
 0x1fc   : > { %p566_p3 = pneg %p565_p1 }
 0x1fe   : > { %717 = dma.done.wait (%p566_p3), %s456_s5, 512  }
 0x1ff   : > { %719 = vsyncadd (%p566_p3), %s456_s5, 4294966784  ;;  %s19_s17 = sadd.s32 1, %s742_s17   ;;  %s975_s12 = smov %s726_s13 }
 0x200   : > { %p16_p5 = scmp.ge.s32.totalorder %s19_s17, 4   ;;  %s976_s13 = smov %s730_s14 }
 0x201   : > { %s977_s14 = smov %s828_s26  ;;  %s978_s15 = smov %s738_s16 }
 0x202   : > { %s979_s16 = smov %s981_s20  ;;  %18 = sbr.rel (!%p16_p5) target bundleno = 6 (0x6), region = 81 }
 0x207   :  { %461 = vsyncpa [#allocation3], 1 }
 0x208   :  { %463 = vsyncpa [#allocation3 + $0x1], 1 }
 0x209   :  { %464 = vsyncpa [#allocation4], 1 }
 0x20a   :  { %466 = vsyncpa [#allocation4 + $0x1], 1 }

</bundles_post_ra>
